<compile_context>
chip_gen: v6e
topology: v6e:2x2x1
jax: 0.10.0
libtpu: 0.0.40
codegen_flags: <defaults>
</compile_context>

<pallas_src>
import functools

import jax
import jax.numpy as jnp
from jax.experimental import pallas as pl
from jax.experimental.pallas import tpu as pltpu


def _round_up(x, m):
    return (x + m - 1) // m * m


def _vmem_limit_bytes():
    """Scoped-VMEM request: ~3/4 of physical, clamped to [32, 96] MiB."""
    cap = 128 * 1024 * 1024
    try:
        cap = int(pltpu.get_tpu_info().vmem_capacity_bytes)
    except Exception:
        pass
    return int(max(32 * 1024 * 1024, min(cap * 3 // 4, 96 * 1024 * 1024)))


def _pick_tm(m, k, cpad, tm_req, vmem_limit):
    """Largest M-tile whose double-buffered working set fits the VMEM budget."""
    tm = min(tm_req, _round_up(m, 8))
    tm = max(8, _round_up(tm, 8))
    budget = int(vmem_limit * 0.8)

    def working_set(t):
        # 2x (patch tile + cached conv tile) bf16, 2x weight bf16, stats f32.
        return 2 * t * (k + cpad) * 2 + 2 * k * cpad * 2 + 8 * cpad * 4

    while tm > 8 and working_set(tm) > budget:
        tm = max(8, _round_up(tm // 2, 8))
    return tm


# ----------------------------- kernels -------------------------------------
def _conv_stats_kernel(p_ref, w_ref, y_ref, stats_ref):
    """Per tile: y = p @ w (cached bf16); stats += [sum(y), sum(y^2)]."""
    acc = jnp.dot(p_ref[...], w_ref[...], preferred_element_type=jnp.float32)
    y_ref[...] = acc.astype(y_ref.dtype)

    @pl.when(pl.program_id(1) == 0)
    def _():
        stats_ref[...] = jnp.zeros_like(stats_ref)

    stats_ref[0:1, :] += jnp.sum(acc, axis=0, keepdims=True)
    stats_ref[1:2, :] += jnp.sum(acc * acc, axis=0, keepdims=True)


def _bn_act_kernel(*refs, skip_mode):
    """out = ReLU( y*scale + shift [+ skip] ) for one (TM, Cpad) tile."""
    if skip_mode == "none":
        y_ref, ss_ref, out_ref = refs
    elif skip_mode == "identity":
        y_ref, ss_ref, skip_ref, out_ref = refs
    else:  # "proj": fused 1x1 projection skip
        y_ref, ss_ref, xs_ref, ws_ref, bs_ref, out_ref = refs

    y = y_ref[...].astype(jnp.float32) * ss_ref[0:1, :] + ss_ref[1:2, :]

    if skip_mode == "identity":
        y = y + skip_ref[...].astype(jnp.float32)
    elif skip_mode == "proj":
        y = y + (jnp.dot(xs_ref[...], ws_ref[...],
                         preferred_element_type=jnp.float32) + bs_ref[...])

    out_ref[...] = jnp.maximum(y, 0.0).astype(out_ref.dtype)


# ----------------------------- pallas_call wrappers -------------------------
def _conv_stats(patches, w, *, tm, n_split, vmem_limit):
    """One fused pass: cached bf16 conv output + per-split channel stats."""
    m_pad, k = patches.shape
    cpad = w.shape[1]
    steps = m_pad // tm
    spp = steps // n_split  # grid steps per split (per core on v7x)
    grid = (n_split, spp)

    y, stats = pl.pallas_call(
        _conv_stats_kernel,
        out_shape=(
            jax.ShapeDtypeStruct((m_pad, cpad), jnp.bfloat16),
            jax.ShapeDtypeStruct((n_split, 2, cpad), jnp.float32),
        ),
        grid=grid,
        in_specs=[
            pl.BlockSpec((tm, k), lambda c, i: (c * spp + i, 0)),
            pl.BlockSpec((k, cpad), lambda c, i: (0, 0)),
        ],
        out_specs=(
            pl.BlockSpec((tm, cpad), lambda c, i: (c * spp + i, 0)),
            pl.BlockSpec((None, 2, cpad), lambda c, i: (c, 0, 0)),
        ),
        compiler_params=pltpu.CompilerParams(
            dimension_semantics=("parallel", "arbitrary"),
            vmem_limit_bytes=vmem_limit),
        cost_estimate=pl.CostEstimate(
            flops=int(2 * m_pad * k * cpad + 4 * m_pad * cpad),
            transcendentals=0,
            bytes_accessed=int(patches.size * 2 + w.size * 2
                               + m_pad * cpad * 2 + n_split * 2 * cpad * 4)),
    )(patches, w)
    return y, stats


def _bn_act(y, scale_shift, skip_args, *, tm, skip_mode, out_dtype,
            vmem_limit):
    """Normalize cached conv output, fuse skip + ReLU, stream result out."""
    m_pad, cpad = y.shape
    grid = (m_pad // tm,)

    in_specs = [
        pl.BlockSpec((tm, cpad), lambda i: (i, 0)),
        pl.BlockSpec((2, cpad), lambda i: (0, 0)),
    ]
    args = [y, scale_shift]
    flops = 4 * m_pad * cpad
    bytes_acc = (y.size * 2 + 2 * cpad * 4
                 + m_pad * cpad * jnp.dtype(out_dtype).itemsize)

    if skip_mode == "identity":
        skip, = skip_args
        in_specs.append(pl.BlockSpec((tm, cpad), lambda i: (i, 0)))
        args.append(skip)
        bytes_acc += skip.size * skip.dtype.itemsize
    elif skip_mode == "proj":
        xs, ws, bs = skip_args
        cin = xs.shape[1]
        in_specs += [
            pl.BlockSpec((tm, cin), lambda i: (i, 0)),
            pl.BlockSpec((cin, cpad), lambda i: (0, 0)),
            pl.BlockSpec((1, cpad), lambda i: (0, 0)),
        ]
        args += [xs, ws, bs]
        flops += 2 * m_pad * cin * cpad
        bytes_acc += xs.size * 2 + ws.size * 2 + cpad * 4

    kernel = functools.partial(_bn_act_kernel, skip_mode=skip_mode)
    return pl.pallas_call(
        kernel,
        out_shape=jax.ShapeDtypeStruct((m_pad, cpad), out_dtype),
        grid=grid,
        in_specs=in_specs,
        out_specs=pl.BlockSpec((tm, cpad), lambda i: (i, 0)),
        compiler_params=pltpu.CompilerParams(
            dimension_semantics=("parallel",),
            vmem_limit_bytes=vmem_limit),
        cost_estimate=pl.CostEstimate(
            flops=int(flops), transcendentals=0,
            bytes_accessed=int(bytes_acc)),
    )(*args)


# ----------------------------- glue ----------------------------------------
def _im2col_3x3(x_nhwc, stride):
    """3x3 / padding=1 patch extraction (glue). Returns ((M, 9*C), dims)."""
    n, h, w, c = x_nhwc.shape
    ho = (h + 2 - 3) // stride + 1
    wo = (w + 2 - 3) // stride + 1
    xp = jnp.pad(x_nhwc, ((0, 0), (1, 1), (1, 1), (0, 0)))
    taps = []
    for kh in range(3):
        for kw in range(3):
            patch = xp[:, kh: kh + (ho - 1) * stride + 1: stride,
                          kw: kw + (wo - 1) * stride + 1: stride, :]
            taps.append(patch.reshape(n * ho * wo, c))
    return jnp.concatenate(taps, axis=-1), (n, ho, wo)


def residual_block(x_nchw, params, *, stride=1, use_1by1=False, tm=1024,
                   eps=1e-5):
    """Forward of the PyTorch ResidualBlock (training-mode BN)."""
    n, cin, h, w = x_nchw.shape
    cout = params["w1"].shape[0]
    cpad = _round_up(cout, 128)
    x = jnp.transpose(x_nchw, (0, 2, 3, 1)).astype(jnp.float32)  # NHWC

    vmem_limit = _vmem_limit_bytes()

    def row(v):  # (Cout,) -> (1, Cpad) lane-padded f32 row
        r = v.reshape(1, -1).astype(jnp.float32)
        return jnp.pad(r, ((0, 0), (0, cpad - cout)))

    def w3x3(wt):  # (Cout, Cin, 3, 3) -> (9*Cin, Cpad) bf16
        ci = wt.shape[1]
        ww = jnp.transpose(wt, (2, 3, 1, 0)).reshape(9 * ci, cout)
        return jnp.pad(ww, ((0, 0), (0, cpad - cout))).astype(jnp.bfloat16)

    def fold_bn(stats_parts, gamma, beta, m_total):
        # Combine per-split partial sums, fold BN into (scale, shift).
        s = jnp.sum(stats_parts, axis=0)                    # (2, Cpad) f32
        mean = s[0] / m_total
        var = s[1] / m_total - mean * mean
        scale = row(gamma)[0] * jax.lax.rsqrt(var + eps)
        shift = row(beta)[0] - mean * scale
        return jnp.stack([scale, shift], axis=0)            # (2, Cpad) f32

    # --- stage 1: conv3x3(stride) -> BN1 (batch stats) -> ReLU --------------
    p1, (n_, ho, wo) = _im2col_3x3(x, stride)
    m = n_ * ho * wo
    tm_eff = _pick_tm(m, 9 * max(cin, cout), cpad, tm, vmem_limit)
    steps = -(-m // tm_eff)
    n_split = 2 if (steps % 2 == 0 and steps >= 2) else 1
    m_pad = steps * tm_eff

    p1 = jnp.pad(p1, ((0, m_pad - m), (0, 0))).astype(jnp.bfloat16)
    w1 = w3x3(params["w1"])
    y1c, stats1 = _conv_stats(p1, w1, tm=tm_eff, n_split=n_split,
                              vmem_limit=vmem_limit)
    ss1 = fold_bn(stats1, params["gamma1"], params["beta1"], m)
    y1 = _bn_act(y1c, ss1, (), tm=tm_eff, skip_mode="none",
                 out_dtype=jnp.bfloat16, vmem_limit=vmem_limit)

    # --- skip branch (fused into the stage-2 normalize kernel) ---------------
    if use_1by1:
        xs = x[:, ::stride, ::stride, :][:, :ho, :wo, :].reshape(m, cin)
        xs = jnp.pad(xs, ((0, m_pad - m), (0, 0))).astype(jnp.bfloat16)
        ws = params["ws"].reshape(cout, cin).T
        ws = jnp.pad(ws, ((0, 0), (0, cpad - cout))).astype(jnp.bfloat16)
        skip_args = (xs, ws, row(params["bs"]))
        skip_mode = "proj"
    else:
        assert stride == 1 and cin == cout, "identity skip needs same shapes"
        skip = jnp.pad(x.reshape(m, cout),
                       ((0, m_pad - m), (0, cpad - cout))).astype(jnp.bfloat16)
        skip_args = (skip,)
        skip_mode = "identity"

    # --- stage 2: conv3x3(1) -> BN2, +skip, ReLU (all fused) ----------------
    y1_nhwc = y1[:m, :cout].reshape(n_, ho, wo, cout)        # bf16
    p2, _ = _im2col_3x3(y1_nhwc, 1)
    p2 = jnp.pad(p2, ((0, m_pad - m), (0, 0)))
    w2 = w3x3(params["w2"])
    y2c, stats2 = _conv_stats(p2, w2, tm=tm_eff, n_split=n_split,
                              vmem_limit=vmem_limit)
    ss2 = fold_bn(stats2, params["gamma2"], params["beta2"], m)
    y2 = _bn_act(y2c, ss2, skip_args, tm=tm_eff, skip_mode=skip_mode,
                 out_dtype=jnp.float32, vmem_limit=vmem_limit)

    out = y2[:m, :cout].reshape(n_, ho, wo, cout)
    return jnp.transpose(out, (0, 3, 1, 2))  # back to NCHW


# ----------------------------- reference (plain JAX) ------------------------
def _reference(x, params, *, stride, use_1by1, eps=1e-5):
    def conv(xx, wt, bb, s, p):
        y = jax.lax.conv_general_dilated(
            xx, wt, window_strides=(s, s), padding=((p, p), (p, p)),
            dimension_numbers=("NCHW", "OIHW", "NCHW"))
        return y + bb[None, :, None, None]

    def bn(xx, g, bt):
        mean = jnp.mean(xx, axis=(0, 2, 3), keepdims=True)
        var = jnp.mean((xx - mean) ** 2, axis=(0, 2, 3), keepdims=True)
        return ((xx - mean) * jax.lax.rsqrt(var + eps)
                * g[None, :, None, None] + bt[None, :, None, None])

    y = jax.nn.relu(bn(conv(x, params["w1"], params["b1"], stride, 1),
                       params["gamma1"], params["beta1"]))
    y = bn(conv(y, params["w2"], params["b2"], 1, 1),
           params["gamma2"], params["beta2"])
    sk = conv(x, params["ws"], params["bs"], stride, 0) if use_1by1 else x
    return jax.nn.relu(y + sk)


def _make_params(key, cin, cout):
    ks = jax.random.split(key, 6)
    return {
        "w1": 0.1 * jax.random.normal(ks[0], (cout, cin, 3, 3), jnp.float32),
        "b1": 0.1 * jax.random.normal(ks[1], (cout,), jnp.float32),
        "gamma1": jnp.ones((cout,), jnp.float32),
        "beta1": jnp.zeros((cout,), jnp.float32),
        "w2": 0.1 * jax.random.normal(ks[2], (cout, cout, 3, 3), jnp.float32),
        "b2": 0.1 * jax.random.normal(ks[3], (cout,), jnp.float32),
        "gamma2": jnp.ones((cout,), jnp.float32),
        "beta2": jnp.zeros((cout,), jnp.float32),
        "ws": 0.1 * jax.random.normal(ks[4], (cout, cin, 1, 1), jnp.float32),
        "bs": 0.1 * jax.random.normal(ks[5], (cout,), jnp.float32),
    }


if __name__ == "__main__":
    key = jax.random.PRNGKey(0)
    kx, kp1, kp2 = jax.random.split(key, 3)

    # Config A: channel change (4 -> 8) with 1x1 projection skip, stride 1.
    x_a = jax.random.normal(kx, (2, 4, 16, 16), jnp.float32)
    params_a = _make_params(kp1, 4, 8)
    out_a = residual_block(x_a, params_a, stride=1, use_1by1=True)
    ref_a = _reference(x_a, params_a, stride=1, use_1by1=True)

    # Config B: identity skip (in == out channels, stride 1, no 1x1 conv).
    x_b = jax.random.normal(kx, (2, 8, 16, 16), jnp.float32)
    params_b = _make_params(kp2, 8, 8)
    out_b = residual_block(x_b, params_b, stride=1, use_1by1=False)
    ref_b = _reference(x_b, params_b, stride=1, use_1by1=False)

    jax.block_until_ready((out_a, out_b))
    assert out_a.shape == (2, 8, 16, 16) and out_b.shape == (2, 8, 16, 16)
    assert jnp.allclose(out_a, ref_a, rtol=2e-2, atol=2e-2)
    assert jnp.allclose(out_b, ref_b, rtol=2e-2, atol=2e-2)
    print("KERNEL_OK")
</pallas_src>

<mosaic_0001>
module attributes {stable_mosaic.version = 11 : i64} {
  func.func @_conv_stats_kernel(%arg0: i32, %arg1: i32, %arg2: memref<512x36xbf16, #tpu.memory_space<vmem>>, %arg3: memref<36x128xbf16, #tpu.memory_space<vmem>>, %arg4: memref<512x128xbf16, #tpu.memory_space<vmem>>, %arg5: memref<1x2x128xf32, #tpu.memory_space<vmem>>) attributes {dimension_semantics = [#tpu.dimension_semantics<parallel>, #tpu.dimension_semantics<arbitrary>], iteration_bounds = array<i64: 1, 1>, scalar_prefetch = 0 : i64, scratch_operands = 0 : i64, tpu.core_type = #tpu.core_type<tc>, window_params = [{transform_indices = @transform_0, window_bounds = array<i64: 512, 36>}, {pipeline_mode = #tpu.pipeline_mode<synchronous>, transform_indices = @transform_1, window_bounds = array<i64: 36, 128>}, {transform_indices = @transform_2, window_bounds = array<i64: 512, 128>}, {transform_indices = @transform_3, window_bounds = array<i64: 1, 2, 128>}]} {
    %c0 = arith.constant 0 : index
    %c0_0 = arith.constant 0 : index
    %0 = vector.load %arg2[%c0, %c0_0] : memref<512x36xbf16, #tpu.memory_space<vmem>>, vector<512x36xbf16>
    %c0_1 = arith.constant 0 : index
    %c0_2 = arith.constant 0 : index
    %1 = vector.load %arg3[%c0_1, %c0_2] : memref<36x128xbf16, #tpu.memory_space<vmem>>, vector<36x128xbf16>
    %cst = arith.constant dense<0.000000e+00> : vector<512x128xf32>
    %2 = tpu.matmul %0, %1, %cst {dimension_numbers = #tpu.dot_dimension_numbers<[1], [0], [0], [1], [0, 0, 1, 1], [], []>} : vector<512x36xbf16>, vector<36x128xbf16>, vector<512x128xf32> -> vector<512x128xf32>
    %3 = arith.truncf %2 : vector<512x128xf32> to vector<512x128xbf16>
    %c0_3 = arith.constant 0 : index
    %c0_4 = arith.constant 0 : index
    %4 = vector.load %arg4[%c0_3, %c0_4] : memref<512x128xbf16, #tpu.memory_space<vmem>>, vector<512x128xbf16>
    tpu.vector_store %arg4[%c0_3, %c0_4], %3 {strides = array<i32>} : memref<512x128xbf16, #tpu.memory_space<vmem>>, vector<512x128xbf16>,
    %c0_i32 = arith.constant 0 : i32
    %5 = arith.cmpi eq, %arg1, %c0_i32 : i32
    %6 = arith.extui %5 : i1 to i32
    %c0_i32_5 = arith.constant 0 : i32
    %7 = arith.cmpi ne, %6, %c0_i32_5 : i32
    scf.if %7 {
      %cst_19 = arith.constant 0.000000e+00 : f32
      %25 = vector.broadcast %cst_19 : f32 to vector<2x128xf32>
      %c0_20 = arith.constant 0 : index
      %c0_21 = arith.constant 0 : index
      %c0_22 = arith.constant 0 : index
      %26 = vector.load %arg5[%c0_20, %c0_21, %c0_22] : memref<1x2x128xf32, #tpu.memory_space<vmem>>, vector<1x2x128xf32>
      %27 = vector.shape_cast %26 : vector<1x2x128xf32> to vector<2x128xf32>
      %28 = vector.shape_cast %25 : vector<2x128xf32> to vector<1x2x128xf32>
      tpu.vector_store %arg5[%c0_20, %c0_21, %c0_22], %28 {strides = array<i32>} : memref<1x2x128xf32, #tpu.memory_space<vmem>>, vector<1x2x128xf32>,
    } else {
    }
    %c0_6 = arith.constant 0 : index
    %c0_7 = arith.constant 0 : index
    %c0_8 = arith.constant 0 : index
    %8 = vector.load %arg5[%c0_6, %c0_7, %c0_8] : memref<1x2x128xf32, #tpu.memory_space<vmem>>, vector<1x1x128xf32>
    %9 = vector.shape_cast %8 : vector<1x1x128xf32> to vector<1x128xf32>
    %cst_9 = arith.constant dense<0.000000e+00> : vector<128xf32>
    %10 = vector.multi_reduction <add>, %2, %cst_9 [0] : vector<512x128xf32> to vector<128xf32>
    %11 = vector.shape_cast %10 : vector<128xf32> to vector<1x128xf32>
    %12 = arith.addf %9, %11 : vector<1x128xf32>
    %c0_10 = arith.constant 0 : index
    %c0_11 = arith.constant 0 : index
    %c0_12 = arith.constant 0 : index
    %13 = vector.load %arg5[%c0_10, %c0_11, %c0_12] : memref<1x2x128xf32, #tpu.memory_space<vmem>>, vector<1x1x128xf32>
    %14 = vector.shape_cast %13 : vector<1x1x128xf32> to vector<1x128xf32>
    %15 = vector.shape_cast %12 : vector<1x128xf32> to vector<1x1x128xf32>
    tpu.vector_store %arg5[%c0_10, %c0_11, %c0_12], %15 {strides = array<i32>} : memref<1x2x128xf32, #tpu.memory_space<vmem>>, vector<1x1x128xf32>,
    %c0_13 = arith.constant 0 : index
    %c1 = arith.constant 1 : index
    %c0_14 = arith.constant 0 : index
    %16 = vector.load %arg5[%c0_13, %c1, %c0_14] : memref<1x2x128xf32, #tpu.memory_space<vmem>>, vector<1x1x128xf32>
    %17 = vector.shape_cast %16 : vector<1x1x128xf32> to vector<1x128xf32>
    %18 = arith.mulf %2, %2 : vector<512x128xf32>
    %cst_15 = arith.constant dense<0.000000e+00> : vector<128xf32>
    %19 = vector.multi_reduction <add>, %18, %cst_15 [0] : vector<512x128xf32> to vector<128xf32>
    %20 = vector.shape_cast %19 : vector<128xf32> to vector<1x128xf32>
    %21 = arith.addf %17, %20 : vector<1x128xf32>
    %c0_16 = arith.constant 0 : index
    %c1_17 = arith.constant 1 : index
    %c0_18 = arith.constant 0 : index
    %22 = vector.load %arg5[%c0_16, %c1_17, %c0_18] : memref<1x2x128xf32, #tpu.memory_space<vmem>>, vector<1x1x128xf32>
    %23 = vector.shape_cast %22 : vector<1x1x128xf32> to vector<1x128xf32>
    %24 = vector.shape_cast %21 : vector<1x128xf32> to vector<1x1x128xf32>
    tpu.vector_store %arg5[%c0_16, %c1_17, %c0_18], %24 {strides = array<i32>} : memref<1x2x128xf32, #tpu.memory_space<vmem>>, vector<1x1x128xf32>,
    return
  }
  func.func @transform_0(%arg0: i32, %arg1: i32) -> (i32, i32) {
    %c1_i32 = arith.constant 1 : i32
    %0 = arith.muli %arg0, %c1_i32 : i32
    %1 = arith.addi %0, %arg1 : i32
    %c0_i32 = arith.constant 0 : i32
    %c0_i32_0 = arith.constant 0 : i32
    return %1, %c0_i32 : i32, i32
  }
  func.func @transform_1(%arg0: i32, %arg1: i32) -> (i32, i32) {
    %c0_i32 = arith.constant 0 : i32
    %c0_i32_0 = arith.constant 0 : i32
    %c0_i32_1 = arith.constant 0 : i32
    return %c0_i32, %c0_i32_0 : i32, i32
  }
  func.func @transform_2(%arg0: i32, %arg1: i32) -> (i32, i32) {
    %c1_i32 = arith.constant 1 : i32
    %0 = arith.muli %arg0, %c1_i32 : i32
    %1 = arith.addi %0, %arg1 : i32
    %c0_i32 = arith.constant 0 : i32
    %c0_i32_0 = arith.constant 0 : i32
    return %1, %c0_i32 : i32, i32
  }
  func.func @transform_3(%arg0: i32, %arg1: i32) -> (i32, i32, i32) {
    %c0_i32 = arith.constant 0 : i32
    %c0_i32_0 = arith.constant 0 : i32
    %c0_i32_1 = arith.constant 0 : i32
    return %arg0, %c0_i32, %c0_i32_0 : i32, i32, i32
  }
}

</mosaic_0001>

<bundles_post_ra>
// kernel: tpu_custom_call.1
= control target key start
LH: loop header
LB: loop body
LE: loop exit
PB: predicated region body
PF: predicated region fallthrough
CT: control target
= control target key end

     0   :  { %9 = vsyncpa [#allocation3], 0  ;;  %vm381_vm0 = vcmask 1041408   ;;  %vm284_vm1 = vcmask 293888   ;;  %s2190_s0 = inlined_call_operand.vmem [shape: bf16[512,36], index: 0, kind: input, shape index: {}]   ;;  %s2191_s1 = inlined_call_operand.vmem [shape: bf16[36,128], index: 1, kind: input, shape index: {}]   ;;  %s2192_s2 = inlined_call_operand.hbm [shape: bf16[512,128], index: 2, kind: output, shape index: {0}]   ;;  %s2193_s3 = inlined_call_operand.hbm [shape: f32[1,2,128], index: 3, kind: output, shape index: {1}]  }
   0x1   :  { %v1751_v0 = vld [vmem:[%s2191_s1 + $0x10] ss:$0 sps:$4 sm:$0x33]   ;;  %v1752_v1 = vld [vmem:[%s2191_s1 + $0x8] sm:$0xff]   ;;  %v1754_v3 = vld [vmem:[%s2190_s0] sm:$0xff]  }
   0x2   :  { %1744 = vmatprep.subr.msk.bf16.mxu0 %vm381_vm0, %v1751_v0  ;;  %v383_v2 = vsel %vm381_vm0, %v1751_v0, 0  ;;  %1745 = vmatprep.subr.msk.bf16.mxu1 %vm381_vm0, %v1751_v0  ;;  %v1753_v4 = vld [vmem:[%s2191_s1] sm:$0xff]   ;;  %v1755_v5 = vld [vmem:[%s2190_s0 + $0x8] sm:$0xff]   ;;  %v1756_v6 = vld [vmem:[%s2190_s0 + $0x10] sm:$0xff]  }
   0x3   :  { %1669 = vmatpush3.bf16.msra.mxu0 %v383_v2  ;;  %1741 = vmatpush3.bf16.msra.mxu1 %v383_v2  ;;  %v1757_v7 = vld [vmem:[%s2190_s0 + $0x18] sm:$0xff]   ;;  %v1758_v8 = vld [vmem:[%s2190_s0 + $0x20] sm:$0xff]   ;;  %v1771_v10 = vld [vmem:[%s2190_s0 + $0x88] sm:$0xff]  }
   0x4   :  { %1670 = vmatprep.subr.bf16.mxu0 %v1752_v1  ;;  %1739 = vmatprep.subr.bf16.mxu1 %v1752_v1  ;;  %v1770_v9 = vld [vmem:[%s2190_s0 + $0x80] sm:$0xff]   ;;  %v1772_v11 = vld [vmem:[%s2190_s0 + $0x90] sm:$0xff]   ;;  %v1759_v12 = vld [vmem:[%s2190_s0 + $0x28] sm:$0xff]  }
   0x5   :  { %1674 = vmatprep.mubr.msk.bf16.mxu0 %vm284_vm1, %v1754_v3  ;;  %1706 = vmatprep.mubr.msk.bf16.mxu1 %vm284_vm1, %v1770_v9  ;;  %v1760_v13 = vld [vmem:[%s2190_s0 + $0x30] sm:$0xff]   ;;  %v1773_v14 = vld [vmem:[%s2190_s0 + $0x98] sm:$0xff]   ;;  %v1774_v15 = vld [vmem:[%s2190_s0 + $0xa0] sm:$0xff]  }
   0x6   :  { %v1761_v16 = vld [vmem:[%s2190_s0 + $0x38] sm:$0xff]   ;;  %v1775_v17 = vld [vmem:[%s2190_s0 + $0xa8] sm:$0xff]   ;;  %v1762_v18 = vld [vmem:[%s2190_s0 + $0x40] sm:$0xff]  }
   0x7   :  { %1671 = vmatpush3.bf16.msra.mxu0 %v1752_v1  ;;  %1742 = vmatpush3.bf16.msra.mxu1 %v1752_v1  ;;  %v1776_v19 = vld [vmem:[%s2190_s0 + $0xb0] sm:$0xff]  }
   0x8   :  { %1672 = vmatprep.subr.bf16.mxu0 %v1753_v4  ;;  %1740 = vmatprep.subr.bf16.mxu1 %v1753_v4 }
   0xb   :  { %1673 = vmatpush3.bf16.msra.mxu0 %v1753_v4  ;;  %1743 = vmatpush3.bf16.msra.mxu1 %v1753_v4 }
   0xe   :  { %1675 = vmatmul.mubr.msk.bf16.vlgmr.msra.gmra.mxu0 %vm284_vm1, %v1755_v5  ;;  %1707 = vmatmul.mubr.msk.bf16.vlgmr.msra.gmra.mxu1 %vm284_vm1, %v1771_v10 }
   0xf   :  { %1678 = vmatprep.mubr.msk.bf16.mxu0 %vm284_vm1, %v1756_v6  ;;  %1710 = vmatprep.mubr.msk.bf16.mxu1 %vm284_vm1, %v1772_v11 }
  0x16   :  { %1679 = vmatmul.mubr.msk.bf16.gmra.mxu0 %vm284_vm1, %v1757_v7  ;;  %1711 = vmatmul.mubr.msk.bf16.gmra.mxu1 %vm284_vm1, %v1773_v14 }
  0x17   :  { %1682 = vmatprep.mubr.msk.bf16.mxu0 %vm284_vm1, %v1758_v8  ;;  %1714 = vmatprep.mubr.msk.bf16.mxu1 %vm284_vm1, %v1774_v15 }
  0x1e   :  { %1683 = vmatmul.mubr.msk.bf16.gmra.mxu0 %vm284_vm1, %v1759_v12 }
  0x1f   :  { %1686 = vmatprep.mubr.msk.bf16.mxu0 %vm284_vm1, %v1760_v13 }
  0x20   :  { %10 = vsyncpa [#allocation5], 0  ;;  %1715 = vmatmul.mubr.msk.bf16.gmra.mxu1 %vm284_vm1, %v1775_v17  ;;  %v1763_v20 = vld [vmem:[%s2190_s0 + $0x48] sm:$0xff]   ;;  %v1777_v21 = vld [vmem:[%s2190_s0 + $0xb8] sm:$0xff]   ;;  %v1830_v50 = vmov 0.0  }
  0x21   :  { %1718 = vmatprep.mubr.msk.bf16.mxu1 %vm284_vm1, %v1776_v19  ;;  %v1764_v22 = vld [vmem:[%s2190_s0 + $0x50] sm:$0xff]   ;;  %v1778_v23 = vld [vmem:[%s2190_s0 + $0xc0] sm:$0xff]   ;;  %v1765_v24 = vld [vmem:[%s2190_s0 + $0x58] sm:$0xff]   ;;  %998 = vst [vmem:[#allocation4] sm:$0x3] %v1830_v50 }
  0x22   :  { %v1779_v25 = vld [vmem:[%s2190_s0 + $0xc8] sm:$0xff]   ;;  %v1766_v26 = vld [vmem:[%s2190_s0 + $0x60] sm:$0xff]   ;;  %v1780_v27 = vld [vmem:[%s2190_s0 + $0xd0] sm:$0xff]  }
  0x23   :  { %v1767_v28 = vld [vmem:[%s2190_s0 + $0x68] sm:$0xff]   ;;  %v1781_v29 = vld [vmem:[%s2190_s0 + $0xd8] sm:$0xff]   ;;  %v1768_v30 = vld [vmem:[%s2190_s0 + $0x70] sm:$0xff]  }
  0x24   :  { %v1782_v31 = vld [vmem:[%s2190_s0 + $0xe0] sm:$0xff]   ;;  %v1769_v32 = vld [vmem:[%s2190_s0 + $0x78] sm:$0xff]   ;;  %v1783_v33 = vld [vmem:[%s2190_s0 + $0xe8] sm:$0xff]  }
  0x25   :  { %v1784_v34 = vld [vmem:[%s2190_s0 + $0xf0] sm:$0xff]   ;;  %v1785_v35 = vld [vmem:[%s2190_s0 + $0xf8] sm:$0xff]   ;;  %s1831_s0 = smov [#allocation2]  }
  0x26   :  { %1687 = vmatmul.mubr.msk.bf16.gmra.mxu0 %vm284_vm1, %v1761_v16  ;;  %s1216_s25 = sshll.u32 %s1831_s0, 4  ;;  %s1217_s25 = int_to_ptr.vmem [resolvable:$true] %s1216_s25 }
  0x27   :  { %1690 = vmatprep.mubr.msk.bf16.mxu0 %vm284_vm1, %v1762_v18  ;;  %s1786_s26 = scalar_lea.vmem %s1217_s25, 4096  ;;  %p1791_p1 = scmp.lt.s32.totalorder %s1217_s25, %s1217_s25 }
  0x28   :  { %1719 = vmatmul.mubr.msk.bf16.gmra.mxu1 %vm284_vm1, %v1777_v21  ;;  %p1787_p0 = scmp.ne.s32.totalorder %s1217_s25, %s1786_s26  ;;  %p1792_p2 = scmp.lt.s32.totalorder %s1786_s26, %s1786_s26 }
  0x29   :  { %1722 = vmatprep.mubr.msk.bf16.mxu1 %vm284_vm1, %v1778_v23 }
  0x2a   :  { %p1793_p3 = por %p1792_p2, %p1791_p1 }
  0x2c   :  { %p1794_p4 = pnand %p1793_p3, %p1787_p0 }
  0x2e   :  { %1691 = vmatmul.mubr.msk.bf16.gmra.mxu0 %vm284_vm1, %v1763_v20 }
  0x2f   :  { %1694 = vmatprep.mubr.msk.bf16.mxu0 %vm284_vm1, %v1764_v22 }
  0x30   :  { %1723 = vmatmul.mubr.msk.bf16.gmra.mxu1 %vm284_vm1, %v1779_v25 }
  0x31   :  { %1726 = vmatprep.mubr.msk.bf16.mxu1 %vm284_vm1, %v1780_v27 }
  0x36   :  { %1695 = vmatmul.mubr.msk.bf16.gmra.mxu0 %vm284_vm1, %v1765_v24 }
  0x37   :  { %1698 = vmatprep.mubr.msk.bf16.mxu0 %vm284_vm1, %v1766_v26 }
  0x38   :  { %1727 = vmatmul.mubr.msk.bf16.gmra.mxu1 %vm284_vm1, %v1781_v29 }
  0x39   :  { %1730 = vmatprep.mubr.msk.bf16.mxu1 %vm284_vm1, %v1782_v31 }
  0x3e   :  { %1699 = vmatmul.mubr.msk.bf16.gmra.mxu0 %vm284_vm1, %v1767_v28 }
  0x3f   :  { %1702 = vmatprep.mubr.msk.bf16.mxu0 %vm284_vm1, %v1768_v30 }
  0x40   :  { %1731 = vmatmul.mubr.msk.bf16.gmra.mxu1 %vm284_vm1, %v1783_v33 }
  0x41   :  { %1734 = vmatprep.mubr.msk.bf16.mxu1 %vm284_vm1, %v1784_v34 }
  0x46   :  { %1703 = vmatmul.mubr.msk.bf16.gmra.mxu0 %vm284_vm1, %v1769_v32 }
  0x48   :  { %1735 = vmatmul.mubr.msk.bf16.gmra.mxu1 %vm284_vm1, %v1785_v35 }
  0xce   :  { %v1676_v36 = vpop.f32.mrf.mxu0  ;;  %v1992_v46 = vpop.f32.mrf.mxu1 }
  0xcf   :  { %v1074_v47 = vmul.f32 %v1676_v36, %v1676_v36 }
  0xd0   :  { %v419_v37 = vpop.f32.mrf.mxu0  ;;  %v1994_v52 = vpop.f32.mrf.mxu1 }
  0xd1   :  { %v1072_v41 = vmul.f32 %v419_v37, %v419_v37 }
  0xd2   :  { %v1677_v38 = vpop.f32.mrf.mxu0  ;;  %v1996_v57 = vpop.f32.mrf.mxu1 }
  0xd3   :  { %v1450_v39 = vpack.c.bf16 %v1677_v38, %v1676_v36  ;;  %v1075_v53 = vmul.f32 %v1677_v38, %v1677_v38  ;;  %v1530_v63 = vpack.c.bf16 %v1996_v57, %v1992_v46 }
  0xd4   :  { %v422_v40 = vpop.f32.mrf.mxu0  ;;  %v2000_v0 = vpop.f32.mrf.mxu1 }
  0xd5   :  { %1602 = vst [vmem:[#allocation2 + $0x8] sm:$0xff] %v1450_v39   ;;  %v1445_v42 = vpack.c.bf16 %v422_v40, %v419_v37  ;;  %v1000_v43 = vadd.f32 %v422_v40, %v419_v37  ;;  %v1073_v44 = vmul.f32 %v422_v40, %v422_v40  ;;  %1618 = vst [vmem:[#allocation2 + $0x88] sm:$0xff] %v1530_v63  }
  0xd6   :  { %v1680_v45 = vpop.f32.mrf.mxu0  ;;  %v1525_v6 = vpack.c.bf16 %v2000_v0, %v1994_v52  ;;  %v2004_v7 = vpop.f32.mrf.mxu1 }
  0xd7   :  { %1446 = vst [vmem:[#allocation2] sm:$0xff] %v1445_v42   ;;  %v1001_v48 = vadd.f32 %v1676_v36, %v1000_v43  ;;  %v1136_v49 = vadd.f32 %v1073_v44, %v1072_v41  ;;  %v1078_v8 = vmul.f32 %v1680_v45, %v1680_v45 }
  0xd8   :  { %v435_v51 = vpop.f32.mrf.mxu0  ;;  %1617 = vst [vmem:[#allocation2 + $0x80] sm:$0xff] %v1525_v6   ;;  %v2006_v12 = vpop.f32.mrf.mxu1 }
  0xd9   :  { %v1137_v54 = vadd.f32 %v1136_v49, %v1074_v47  ;;  %v1002_v55 = vadd.f32 %v1677_v38, %v1001_v48  ;;  %v1076_v59 = vmul.f32 %v435_v51, %v435_v51 }
  0xda   :  { %v1681_v56 = vpop.f32.mrf.mxu0  ;;  %v2008_v17 = vpop.f32.mrf.mxu1 }
  0xdb   :  { %v1003_v58 = vadd.f32 %v1002_v55, %v435_v51  ;;  %v1138_v60 = vadd.f32 %v1137_v54, %v1075_v53  ;;  %v1460_v61 = vpack.c.bf16 %v1681_v56, %v1680_v45  ;;  %v1079_v13 = vmul.f32 %v1681_v56, %v1681_v56 }
  0xdc   :  { %v438_v62 = vpop.f32.mrf.mxu0  ;;  %v1540_v23 = vpack.c.bf16 %v2008_v17, %v2004_v7  ;;  %v2012_v24 = vpop.f32.mrf.mxu1 }
  0xdd   :  { %v1139_v1 = vadd.f32 %v1138_v60, %v1076_v59  ;;  %1604 = vst [vmem:[#allocation2 + $0x18] sm:$0xff] %v1460_v61   ;;  %v1455_v2 = vpack.c.bf16 %v438_v62, %v435_v51  ;;  %v1004_v3 = vadd.f32 %v1003_v58, %v438_v62  ;;  %v1077_v4 = vmul.f32 %v438_v62, %v438_v62 }
  0xde   :  { %v1684_v5 = vpop.f32.mrf.mxu0  ;;  %1620 = vst [vmem:[#allocation2 + $0x98] sm:$0xff] %v1540_v23   ;;  %v1535_v30 = vpack.c.bf16 %v2012_v24, %v2006_v12 }
  0xdf   :  { %1603 = vst [vmem:[#allocation2 + $0x10] sm:$0xff] %v1455_v2   ;;  %v1005_v9 = vadd.f32 %v1680_v45, %v1004_v3  ;;  %v1140_v10 = vadd.f32 %v1139_v1, %v1077_v4  ;;  %v1082_v32 = vmul.f32 %v1684_v5, %v1684_v5 }
  0xe0   :  { %v451_v11 = vpop.f32.mrf.mxu0  ;;  %v2016_v31 = vpop.f32.mrf.mxu1  ;;  %1619 = vst [vmem:[#allocation2 + $0x90] sm:$0xff] %v1535_v30  }
  0xe1   :  { %v1141_v14 = vadd.f32 %v1140_v10, %v1078_v8  ;;  %v1006_v15 = vadd.f32 %v1681_v56, %v1005_v9  ;;  %v1080_v19 = vmul.f32 %v451_v11, %v451_v11 }
  0xe2   :  { %v1685_v16 = vpop.f32.mrf.mxu0  ;;  %v2018_v36 = vpop.f32.mrf.mxu1 }
  0xe3   :  { %v1007_v18 = vadd.f32 %v1006_v15, %v451_v11  ;;  %v1142_v20 = vadd.f32 %v1141_v14, %v1079_v13  ;;  %v1470_v21 = vpack.c.bf16 %v1685_v16, %v1684_v5  ;;  %v1083_v37 = vmul.f32 %v1685_v16, %v1685_v16 }
  0xe4   :  { %v454_v22 = vpop.f32.mrf.mxu0  ;;  %v2020_v41 = vpop.f32.mrf.mxu1 }
  0xe5   :  { %v1143_v25 = vadd.f32 %v1142_v20, %v1080_v19  ;;  %1606 = vst [vmem:[#allocation2 + $0x28] sm:$0xff] %v1470_v21   ;;  %v1465_v26 = vpack.c.bf16 %v454_v22, %v451_v11  ;;  %v1008_v27 = vadd.f32 %v1007_v18, %v454_v22  ;;  %v1081_v28 = vmul.f32 %v454_v22, %v454_v22 }
  0xe6   :  { %v1688_v29 = vpop.f32.mrf.mxu0  ;;  %v1550_v48 = vpack.c.bf16 %v2020_v41, %v2016_v31  ;;  %v2024_v49 = vpop.f32.mrf.mxu1 }
  0xe7   :  { %1605 = vst [vmem:[#allocation2 + $0x20] sm:$0xff] %v1465_v26   ;;  %v1009_v33 = vadd.f32 %v1684_v5, %v1008_v27  ;;  %v1144_v34 = vadd.f32 %v1143_v25, %v1081_v28  ;;  %v1545_v56 = vpack.c.bf16 %v2024_v49, %v2018_v36  ;;  %v1086_v59 = vmul.f32 %v1688_v29, %v1688_v29 }
  0xe8   :  { %v467_v35 = vpop.f32.mrf.mxu0  ;;  %1622 = vst [vmem:[#allocation2 + $0xa8] sm:$0xff] %v1550_v48   ;;  %v2028_v58 = vpop.f32.mrf.mxu1 }
  0xe9   :  { %v1145_v38 = vadd.f32 %v1144_v34, %v1082_v32  ;;  %v1010_v39 = vadd.f32 %v1685_v16, %v1009_v33  ;;  %v1084_v43 = vmul.f32 %v467_v35, %v467_v35  ;;  %1621 = vst [vmem:[#allocation2 + $0xa0] sm:$0xff] %v1545_v56  }
  0xea   :  { %v1689_v40 = vpop.f32.mrf.mxu0  ;;  %v2030_v63 = vpop.f32.mrf.mxu1 }
  0xeb   :  { %v1011_v42 = vadd.f32 %v1010_v39, %v467_v35  ;;  %v1146_v44 = vadd.f32 %v1145_v38, %v1083_v37  ;;  %v1480_v45 = vpack.c.bf16 %v1689_v40, %v1688_v29  ;;  %v1087_v1 = vmul.f32 %v1689_v40, %v1689_v40 }
  0xec   :  { %v470_v47 = vpop.f32.mrf.mxu0  ;;  %v2032_v5 = vpop.f32.mrf.mxu1 }
  0xed   :  { %v1147_v50 = vadd.f32 %v1146_v44, %v1084_v43  ;;  %1608 = vst [vmem:[#allocation2 + $0x38] sm:$0xff] %v1480_v45   ;;  %v1475_v51 = vpack.c.bf16 %v470_v47, %v467_v35  ;;  %v1012_v53 = vadd.f32 %v1011_v42, %v470_v47  ;;  %v1085_v54 = vmul.f32 %v470_v47, %v470_v47 }
  0xee   :  { %v1692_v55 = vpop.f32.mrf.mxu0  ;;  %v1560_v13 = vpack.c.bf16 %v2032_v5, %v2028_v58  ;;  %v2036_v14 = vpop.f32.mrf.mxu1 }
  0xef   :  { %1607 = vst [vmem:[#allocation2 + $0x30] sm:$0xff] %v1475_v51   ;;  %v1013_v60 = vadd.f32 %v1688_v29, %v1012_v53  ;;  %v1148_v61 = vadd.f32 %v1147_v50, %v1085_v54  ;;  %v1555_v21 = vpack.c.bf16 %v2036_v14, %v2030_v63  ;;  %v1090_v23 = vmul.f32 %v1692_v55, %v1692_v55 }
  0xf0   :  { %v483_v62 = vpop.f32.mrf.mxu0  ;;  %1624 = vst [vmem:[#allocation2 + $0xb8] sm:$0xff] %v1560_v13   ;;  %v2040_v22 = vpop.f32.mrf.mxu1 }
  0xf1   :  { %v1149_v2 = vadd.f32 %v1148_v61, %v1086_v59  ;;  %v1014_v3 = vadd.f32 %v1689_v40, %v1013_v60  ;;  %v1088_v8 = vmul.f32 %v483_v62, %v483_v62  ;;  %1623 = vst [vmem:[#allocation2 + $0xb0] sm:$0xff] %v1555_v21  }
  0xf2   :  { %v1693_v4 = vpop.f32.mrf.mxu0  ;;  %v2042_v28 = vpop.f32.mrf.mxu1 }
  0xf3   :  { %v1015_v6 = vadd.f32 %v1014_v3, %v483_v62  ;;  %v1150_v9 = vadd.f32 %v1149_v2, %v1087_v1  ;;  %v1490_v10 = vpack.c.bf16 %v1693_v4, %v1692_v55  ;;  %v1091_v29 = vmul.f32 %v1693_v4, %v1693_v4 }
  0xf4   :  { %v486_v11 = vpop.f32.mrf.mxu0  ;;  %v2044_v34 = vpop.f32.mrf.mxu1 }
  0xf5   :  { %v1151_v15 = vadd.f32 %v1150_v9, %v1088_v8  ;;  %1610 = vst [vmem:[#allocation2 + $0x48] sm:$0xff] %v1490_v10   ;;  %v1485_v16 = vpack.c.bf16 %v486_v11, %v483_v62  ;;  %v1016_v18 = vadd.f32 %v1015_v6, %v486_v11  ;;  %v1089_v19 = vmul.f32 %v486_v11, %v486_v11 }
  0xf6   :  { %v1696_v20 = vpop.f32.mrf.mxu0  ;;  %v1570_v42 = vpack.c.bf16 %v2044_v34, %v2040_v22  ;;  %v2048_v43 = vpop.f32.mrf.mxu1 }
  0xf7   :  { %1609 = vst [vmem:[#allocation2 + $0x40] sm:$0xff] %v1485_v16   ;;  %v1017_v25 = vadd.f32 %v1692_v55, %v1016_v18  ;;  %v1152_v26 = vadd.f32 %v1151_v15, %v1089_v19  ;;  %v1565_v51 = vpack.c.bf16 %v2048_v43, %v2042_v28  ;;  %v1094_v54 = vmul.f32 %v1696_v20, %v1696_v20 }
  0xf8   :  { %v499_v27 = vpop.f32.mrf.mxu0  ;;  %1626 = vst [vmem:[#allocation2 + $0xc8] sm:$0xff] %v1570_v42   ;;  %v2052_v53 = vpop.f32.mrf.mxu1 }
  0xf9   :  { %v1153_v30 = vadd.f32 %v1152_v26, %v1090_v23  ;;  %v1018_v32 = vadd.f32 %v1693_v4, %v1017_v25  ;;  %v1092_v37 = vmul.f32 %v499_v27, %v499_v27  ;;  %1625 = vst [vmem:[#allocation2 + $0xc0] sm:$0xff] %v1565_v51  }
  0xfa   :  { %v1697_v33 = vpop.f32.mrf.mxu0  ;;  %v2054_v60 = vpop.f32.mrf.mxu1 }
  0xfb   :  { %v1019_v35 = vadd.f32 %v1018_v32, %v499_v27  ;;  %v1154_v38 = vadd.f32 %v1153_v30, %v1091_v29  ;;  %v1500_v39 = vpack.c.bf16 %v1697_v33, %v1696_v20  ;;  %v1095_v61 = vmul.f32 %v1697_v33, %v1697_v33 }
  0xfc   :  { %v502_v40 = vpop.f32.mrf.mxu0  ;;  %v2056_v3 = vpop.f32.mrf.mxu1 }
  0xfd   :  { %v1155_v44 = vadd.f32 %v1154_v38, %v1092_v37  ;;  %1612 = vst [vmem:[#allocation2 + $0x58] sm:$0xff] %v1500_v39   ;;  %v1495_v45 = vpack.c.bf16 %v502_v40, %v499_v27  ;;  %v1020_v47 = vadd.f32 %v1019_v35, %v502_v40  ;;  %v1093_v48 = vmul.f32 %v502_v40, %v502_v40 }
  0xfe   :  { %v1700_v50 = vpop.f32.mrf.mxu0  ;;  %v1580_v11 = vpack.c.bf16 %v2056_v3, %v2052_v53  ;;  %v2060_v13 = vpop.f32.mrf.mxu1 }
  0xff   :  { %1611 = vst [vmem:[#allocation2 + $0x50] sm:$0xff] %v1495_v45   ;;  %v1021_v55 = vadd.f32 %v1696_v20, %v1020_v47  ;;  %v1156_v56 = vadd.f32 %v1155_v44, %v1093_v48  ;;  %v1575_v21 = vpack.c.bf16 %v2060_v13, %v2054_v60  ;;  %v1098_v25 = vmul.f32 %v1700_v50, %v1700_v50 }
 0x100   :  { %v515_v59 = vpop.f32.mrf.mxu0  ;;  %1628 = vst [vmem:[#allocation2 + $0xd8] sm:$0xff] %v1580_v11   ;;  %v2064_v23 = vpop.f32.mrf.mxu1 }
 0x101   :  { %v1157_v62 = vadd.f32 %v1156_v56, %v1094_v54  ;;  %v1022_v1 = vadd.f32 %v1697_v33, %v1021_v55  ;;  %v1096_v6 = vmul.f32 %v515_v59, %v515_v59  ;;  %1627 = vst [vmem:[#allocation2 + $0xd0] sm:$0xff] %v1575_v21  }
 0x102   :  { %v1701_v2 = vpop.f32.mrf.mxu0  ;;  %v2066_v30 = vpop.f32.mrf.mxu1 }
 0x103   :  { %v1023_v4 = vadd.f32 %v1022_v1, %v515_v59  ;;  %v1158_v8 = vadd.f32 %v1157_v62, %v1095_v61  ;;  %v1510_v9 = vpack.c.bf16 %v1701_v2, %v1700_v50  ;;  %v1099_v32 = vmul.f32 %v1701_v2, %v1701_v2 }
 0x104   :  { %v518_v10 = vpop.f32.mrf.mxu0  ;;  %v2068_v38 = vpop.f32.mrf.mxu1 }
 0x105   :  { %v1159_v15 = vadd.f32 %v1158_v8, %v1096_v6  ;;  %1614 = vst [vmem:[#allocation2 + $0x68] sm:$0xff] %v1510_v9   ;;  %v1505_v16 = vpack.c.bf16 %v518_v10, %v515_v59  ;;  %v1024_v18 = vadd.f32 %v1023_v4, %v518_v10  ;;  %v1097_v19 = vmul.f32 %v518_v10, %v518_v10 }
 0x106   :  { %v1704_v20 = vpop.f32.mrf.mxu0  ;;  %v1590_v47 = vpack.c.bf16 %v2068_v38, %v2064_v23  ;;  %v2072_v48 = vpop.f32.mrf.mxu1  ;;  %v1104_v10 = vmul.f32 %v1994_v52, %v1994_v52 }
 0x107   :  { %1613 = vst [vmem:[#allocation2 + $0x60] sm:$0xff] %v1505_v16   ;;  %v1025_v26 = vadd.f32 %v1700_v50, %v1024_v18  ;;  %v1160_v27 = vadd.f32 %v1159_v15, %v1097_v19  ;;  %v1585_v56 = vpack.c.bf16 %v2072_v48, %v2066_v30  ;;  %v1102_v61 = vmul.f32 %v1704_v20, %v1704_v20 }
 0x108   :  { %v531_v29 = vpop.f32.mrf.mxu0  ;;  %1630 = vst [vmem:[#allocation2 + $0xe8] sm:$0xff] %v1590_v47   ;;  %v2076_v59 = vpop.f32.mrf.mxu1 }
 0x109   :  { %v1161_v33 = vadd.f32 %v1160_v27, %v1098_v25  ;;  %v1026_v35 = vadd.f32 %v1701_v2, %v1025_v26  ;;  %v1100_v40 = vmul.f32 %v531_v29, %v531_v29  ;;  %1629 = vst [vmem:[#allocation2 + $0xe0] sm:$0xff] %v1585_v56   ;;  %v1106_v26 = vmul.f32 %v1992_v46, %v1992_v46 }
 0x10a   :  { %v1705_v37 = vpop.f32.mrf.mxu0  ;;  %v2078_v2 = vpop.f32.mrf.mxu1 }
 0x10b   :  { %v1027_v39 = vadd.f32 %v1026_v35, %v531_v29  ;;  %v1162_v42 = vadd.f32 %v1161_v33, %v1099_v32  ;;  %v1520_v44 = vpack.c.bf16 %v1705_v37, %v1704_v20  ;;  %v1103_v4 = vmul.f32 %v1705_v37, %v1705_v37 }
 0x10c   :  { %v534_v45 = vpop.f32.mrf.mxu0  ;;  %v2080_v9 = vpop.f32.mrf.mxu1 }
 0x10d   :  { %v1163_v50 = vadd.f32 %v1162_v42, %v1100_v40  ;;  %1616 = vst [vmem:[#allocation2 + $0x78] sm:$0xff] %v1520_v44   ;;  %v1515_v51 = vpack.c.bf16 %v534_v45, %v531_v29  ;;  %v1028_v54 = vadd.f32 %v1027_v39, %v534_v45  ;;  %v1101_v55 = vmul.f32 %v534_v45, %v534_v45 }
 0x10e   :  { %v1600_v16 = vpack.c.bf16 %v2080_v9, %v2076_v59  ;;  %v2087_v18 = vpop.f32.mrf.mxu1 }
 0x10f   :  { %1615 = vst [vmem:[#allocation2 + $0x70] sm:$0xff] %v1515_v51   ;;  %v1029_v62 = vadd.f32 %v1704_v20, %v1028_v54  ;;  %v1164_v1 = vadd.f32 %v1163_v50, %v1101_v55  ;;  %v1105_v20 = vmul.f32 %v2000_v0, %v2000_v0  ;;  %v1595_v25 = vpack.c.bf16 %v2087_v18, %v2078_v2 }
 0x110   :  { %1632 = vst [vmem:[#allocation2 + $0xf8] sm:$0xff] %v1600_v16  }
 0x111   :  { %v1030_v6 = vadd.f32 %v1705_v37, %v1029_v62  ;;  %v1165_v8 = vadd.f32 %v1164_v1, %v1102_v61  ;;  %1631 = vst [vmem:[#allocation2 + $0xf0] sm:$0xff] %v1595_v25  }
 0x113   :  { %v1166_v11 = vadd.f32 %v1165_v8, %v1103_v4  ;;  %v1031_v15 = vadd.f32 %v1030_v6, %v1994_v52 }
 0x115   :  { %v1032_v19 = vadd.f32 %v1031_v15, %v2000_v0  ;;  %v1167_v21 = vadd.f32 %v1166_v11, %v1104_v10 }
 0x117   :  { %v1033_v52 = vadd.f32 %v1992_v46, %v1032_v19  ;;  %v1168_v27 = vadd.f32 %v1167_v21, %v1105_v20 }
 0x118   :  { %1797 = shalt.err (!%p1794_p4)
}
 0x119   :  { %s1832_s27 = smov 64   ;;  %s1833_s28 = smov 4   ;;  %v1107_v0 = vmul.f32 %v1996_v57, %v1996_v57  ;;  %v1169_v29 = vadd.f32 %v1168_v27, %v1106_v26  ;;  %v1034_v46 = vadd.f32 %v1996_v57, %v1033_v52  ;;  %v1108_v33 = vmul.f32 %v2006_v12, %v2006_v12 }
 0x11a   :  { %1222 = dma.vmem_to_hbm [thread:$0]  %s1217_s25, 4096, %s2192_s2, [#allocation3], %s1832_s27, %s1832_s27, %s1833_s28   ;;  %v1109_v40 = vmul.f32 %v2012_v24, %v2012_v24  ;;  %v1110_v42 = vmul.f32 %v2004_v7, %v2004_v7  ;;  %v1111_v57 = vmul.f32 %v2008_v17, %v2008_v17  ;;  %v1112_v51 = vmul.f32 %v2018_v36, %v2018_v36 }
 0x11b   :  { %v1035_v32 = vadd.f32 %v1034_v46, %v2006_v12  ;;  %v1170_v35 = vadd.f32 %v1169_v29, %v1107_v0  ;;  %v1113_v56 = vmul.f32 %v2024_v49, %v2024_v49  ;;  %v1116_v6 = vmul.f32 %v2030_v63, %v2030_v63  ;;  %s1834_s2 = smov [#allocation4]  }
 0x11c   :  { %v1117_v11 = vmul.f32 %v2036_v14, %v2036_v14  ;;  %v1120_v21 = vmul.f32 %v2042_v28, %v2042_v28  ;;  %v1121_v52 = vmul.f32 %v2048_v43, %v2048_v43  ;;  %s1229_s4 = sshll.u32 %s1834_s2, 4  ;;  %s1230_s4 = int_to_ptr.vmem [resolvable:$true] %s1229_s4 }
 0x11d   :  { %v1171_v37 = vadd.f32 %v1170_v35, %v1108_v33  ;;  %v1036_v39 = vadd.f32 %v1035_v32, %v2012_v24  ;;  %v1124_v32 = vmul.f32 %v2054_v60, %v2054_v60  ;;  %s1806_s5 = scalar_lea.vmem %s1230_s4, 32  ;;  %p1811_p6 = scmp.lt.s32.totalorder %s1230_s4, %s1230_s4 }
 0x11e   :  { %p1807_p5 = scmp.ne.s32.totalorder %s1230_s4, %s1806_s5  ;;  %p1812_p7 = scmp.lt.s32.totalorder %s1806_s5, %s1806_s5 }
 0x11f   :  { %v1037_v44 = vadd.f32 %v2004_v7, %v1036_v39  ;;  %v1172_v45 = vadd.f32 %v1171_v37, %v1109_v40  ;;  %v1114_v7 = vmul.f32 %v2016_v31, %v2016_v31  ;;  %v1125_v37 = vmul.f32 %v2060_v13, %v2060_v13 }
 0x120   :  { %p1813_p8 = por %p1812_p7, %p1811_p6 }
 0x121   :  { %v1173_v47 = vadd.f32 %v1172_v45, %v1110_v42  ;;  %v1038_v50 = vadd.f32 %v2008_v17, %v1037_v44  ;;  %v1115_v17 = vmul.f32 %v2020_v41, %v2020_v41  ;;  %v1128_v45 = vmul.f32 %v2066_v30, %v2066_v30 }
 0x122   :  { %p1814_p9 = pnand %p1813_p8, %p1807_p5 }
 0x123   :  { %v1039_v12 = vadd.f32 %v1038_v50, %v2018_v36  ;;  %v1174_v54 = vadd.f32 %v1173_v47, %v1111_v57  ;;  %v1129_v50 = vmul.f32 %v2072_v48, %v2072_v48 }
 0x125   :  { %v1175_v55 = vadd.f32 %v1174_v54, %v1112_v51  ;;  %v1040_v24 = vadd.f32 %v1039_v12, %v2024_v49 }
 0x127   :  { %v1041_v61 = vadd.f32 %v2016_v31, %v1040_v24  ;;  %v1176_v62 = vadd.f32 %v1175_v55, %v1113_v56  ;;  %v1118_v31 = vmul.f32 %v2028_v58, %v2028_v58  ;;  %v1132_v24 = vmul.f32 %v2078_v2, %v2078_v2 }
 0x129   :  { %v1177_v1 = vadd.f32 %v1176_v62, %v1114_v7  ;;  %v1042_v4 = vadd.f32 %v2020_v41, %v1041_v61  ;;  %v1119_v41 = vmul.f32 %v2032_v5, %v2032_v5  ;;  %v1133_v61 = vmul.f32 %v2087_v18, %v2087_v18 }
 0x12b   :  { %v1043_v36 = vadd.f32 %v1042_v4, %v2030_v63  ;;  %v1178_v8 = vadd.f32 %v1177_v1, %v1115_v17 }
 0x12d   :  { %v1179_v10 = vadd.f32 %v1178_v8, %v1116_v6  ;;  %v1044_v49 = vadd.f32 %v1043_v36, %v2036_v14 }
 0x12f   :  { %v1045_v15 = vadd.f32 %v2028_v58, %v1044_v49  ;;  %v1180_v16 = vadd.f32 %v1179_v10, %v1117_v11  ;;  %v1122_v58 = vmul.f32 %v2040_v22, %v2040_v22 }
 0x131   :  { %v1181_v19 = vadd.f32 %v1180_v16, %v1118_v31  ;;  %v1046_v20 = vadd.f32 %v2032_v5, %v1045_v15  ;;  %v1123_v5 = vmul.f32 %v2044_v34, %v2044_v34  ;;  %v999_v16 = vld [vmem:[#allocation4] sm:$0x1] }
 0x133   :  { %v1047_v63 = vadd.f32 %v1046_v20, %v2042_v28  ;;  %v1182_v25 = vadd.f32 %v1181_v19, %v1119_v41  ;;  %v1071_v19 = vld [vmem:[#allocation4 + $0x1] sm:$0x1] }
 0x135   :  { %v1183_v26 = vadd.f32 %v1182_v25, %v1120_v21  ;;  %v1048_v14 = vadd.f32 %v1047_v63, %v2048_v43 }
 0x137   :  { %v1049_v27 = vadd.f32 %v2040_v22, %v1048_v14  ;;  %v1184_v0 = vadd.f32 %v1183_v26, %v1121_v52  ;;  %v1126_v22 = vmul.f32 %v2052_v53, %v2052_v53 }
 0x139   :  { %v1185_v29 = vadd.f32 %v1184_v0, %v1122_v58  ;;  %v1050_v46 = vadd.f32 %v2044_v34, %v1049_v27  ;;  %v1127_v34 = vmul.f32 %v2056_v3, %v2056_v3 }
 0x13b   :  { %v1051_v28 = vadd.f32 %v1050_v46, %v2054_v60  ;;  %v1186_v33 = vadd.f32 %v1185_v29, %v1123_v5 }
 0x13d   :  { %v1187_v35 = vadd.f32 %v1186_v33, %v1124_v32  ;;  %v1052_v43 = vadd.f32 %v1051_v28, %v2060_v13 }
 0x13f   :  { %v1053_v39 = vadd.f32 %v2052_v53, %v1052_v43  ;;  %v1188_v40 = vadd.f32 %v1187_v35, %v1125_v37  ;;  %v1130_v53 = vmul.f32 %v2064_v23, %v2064_v23 }
 0x141   :  { %v1189_v42 = vadd.f32 %v1188_v40, %v1126_v22  ;;  %v1054_v44 = vadd.f32 %v2056_v3, %v1053_v39  ;;  %v1131_v3 = vmul.f32 %v2068_v38, %v2068_v38 }
 0x143   :  { %v1055_v60 = vadd.f32 %v1054_v44, %v2066_v30  ;;  %v1190_v57 = vadd.f32 %v1189_v42, %v1127_v34 }
 0x145   :  { %v1191_v47 = vadd.f32 %v1190_v57, %v1128_v45  ;;  %v1056_v13 = vadd.f32 %v1055_v60, %v2072_v48 }
 0x147   :  { %v1057_v12 = vadd.f32 %v2064_v23, %v1056_v13  ;;  %v1192_v51 = vadd.f32 %v1191_v47, %v1129_v50  ;;  %v1134_v23 = vmul.f32 %v2076_v59, %v2076_v59 }
 0x149   :  { %v1193_v54 = vadd.f32 %v1192_v51, %v1130_v53  ;;  %v1058_v55 = vadd.f32 %v2068_v38, %v1057_v12  ;;  %v1135_v38 = vmul.f32 %v2080_v9, %v2080_v9 }
 0x14b   :  { %v1059_v30 = vadd.f32 %v1058_v55, %v2078_v2  ;;  %v1194_v56 = vadd.f32 %v1193_v54, %v1131_v3 }
 0x14d   :  { %v1195_v7 = vadd.f32 %v1194_v56, %v1132_v24  ;;  %v1060_v48 = vadd.f32 %v1059_v30, %v2087_v18 }
 0x14f   :  { %v1061_v62 = vadd.f32 %v2076_v59, %v1060_v48  ;;  %v1196_v17 = vadd.f32 %v1195_v7, %v1133_v61 }
 0x151   :  { %v1062_v1 = vadd.f32 %v2080_v9, %v1061_v62  ;;  %v1197_v4 = vadd.f32 %v1196_v17, %v1134_v23 }
 0x153   :  { %v1063_v2 = vrot.slane %v1062_v1, 4  ;;  %v1198_v36 = vadd.f32 %v1197_v4, %v1135_v38 }
 0x155   :  { %v1064_v6 = vadd.f32 %v1063_v2, %v1062_v1  ;;  %v1199_v8 = vrot.slane %v1198_v36, 4 }
 0x157   :  { %v1065_v10 = vrot.slane %v1064_v6, 2  ;;  %v1200_v49 = vadd.f32 %v1199_v8, %v1198_v36 }
 0x159   :  { %v1066_v11 = vadd.f32 %v1065_v10, %v1064_v6  ;;  %v1201_v18 = vrot.slane %v1200_v49, 2 }
 0x15b   :  { %v1067_v31 = vrot.slane %v1066_v11, 1  ;;  %v1202_v15 = vadd.f32 %v1201_v18, %v1200_v49 }
 0x15d   :  { %v1068_v41 = vadd.f32 %v1067_v31, %v1066_v11  ;;  %v1203_v59 = vrot.slane %v1202_v15, 1 }
 0x15f   :  { %v1069_v20 = vadd.f32 %v1068_v41, %v999_v16  ;;  %v1204_v63 = vadd.f32 %v1203_v59, %v1202_v15 }
 0x161   :  { %1070 = vst [vmem:[#allocation4] sm:$0x1] %v1069_v20  ;;  %v1205_v9 = vadd.f32 %v1204_v63, %v1071_v19 }
 0x163   :  { %1206 = vst [vmem:[#allocation4 + $0x1] sm:$0x1] %v1205_v9 }
 0x164   :  { %1817 = shalt.err (!%p1814_p9)
}
 0x165   :  { %1232 = dma.vmem_to_hbm [thread:$0]  %s1230_s4, 32, %s2193_s3, [#allocation5]  }
 0x166   :  { %1826 = dma.done.wait [#allocation3], 4096  }
 0x167   :  { %1827 = vsyncadd [#allocation3], 4294963200 }
 0x168   :  { %1828 = dma.done.wait [#allocation5], 32  }
 0x169   :  { %1829 = vsyncadd [#allocation5], 4294967264 }
 0x16a   :  { %1239 = vsyncpa [#allocation3], 1 }
 0x16b   :  { %1240 = vsyncpa [#allocation5], 1 }

</bundles_post_ra>
